<compile_context>
chip_gen: v7x
topology: tpu7x:2x2x1
jax: 0.10.0
libtpu: 0.0.40
codegen_flags: <defaults>
</compile_context>

<pallas_src>
import functools

import jax
import jax.numpy as jnp
from jax.experimental import pallas as pl
from jax.experimental.pallas import tpu as pltpu

LANE = 128  # lane granule: batch sits on the lane axis in the kernel


def _round_up(x: int, m: int) -> int:
    return ((x + m - 1) // m) * m


def _cdiv(a: int, b: int) -> int:
    return -(-a // b)


def _zprior_kernel(u_ref, w1_ref, b1_ref, w2_ref, b2_ref, w3_ref, b3_ref,
                   z_ref):
    """Fused ZPriorContinuous forward, transposed layout (batch on lanes).

    u_ref  : (U,  TB)   input tile (u^T)
    w1_ref : (H,  U)    torch-layout (out, in) weight
    b1_ref : (H,  1)
    w2_ref : (H,  H)
    b2_ref : (H,  1)
    w3_ref : (2Z, H)    merged mean+logvar head
    b3_ref : (2Z, 1)
    z_ref  : (2Z, TB)   output tile (z^T); chunk happens in the wrapper
    """
    u = u_ref[...].astype(jnp.float32)

    # Linear -> Tanh -> Linear -> Tanh (tanh runs on the EUP slot).
    h = jnp.tanh(
        jnp.dot(w1_ref[...], u, preferred_element_type=jnp.float32)
        + b1_ref[...])
    h = jnp.tanh(
        jnp.dot(w2_ref[...], h, preferred_element_type=jnp.float32)
        + b2_ref[...])

    # Single merged output head -> one MXU dispatch, one lane-dense store.
    z_ref[...] = (
        jnp.dot(w3_ref[...], h, preferred_element_type=jnp.float32)
        + b3_ref[...]
    ).astype(z_ref.dtype)


@functools.partial(jax.jit, static_argnames=("tile_b",))
def zprior_continuous(u, params, *, tile_b: int = 4096):
    """u: (B, u_dim) float32.  Returns (mean, logvar), each (B, z_dim)."""
    B, u_dim = u.shape
    w1, b1 = params["w1"], params["b1"]
    w2, b2 = params["w2"], params["b2"]
    w3, b3 = params["w3"], params["b3"]
    hidden = w1.shape[0]
    z2 = w3.shape[0]          # 2 * z_dim
    z_dim = z2 // 2

    # --- tile selection ---------------------------------------------------
    # Lane-granule tile, padding bounded to ~one granule, and >= 2 grid steps
    # whenever the batch allows (keeps v7x's second TensorCore busy).
    tile_b = max(LANE, _round_up(int(tile_b), LANE))
    n_tiles = max(1, _cdiv(B, tile_b))
    if n_tiles < 2 and B > LANE:
        n_tiles = 2
    tb = _round_up(_cdiv(B, n_tiles), LANE)
    grid_n = _cdiv(B, tb)
    Bp = grid_n * tb

    # Batch onto the lane axis: (u_dim, B), lane-padded to Bp.
    uT = u.T
    if Bp != B:
        uT = jnp.pad(uT, ((0, 0), (0, Bp - B)))

    def full(arr):
        # Whole-array block, constant index_map -> VMEM-resident across steps.
        return pl.BlockSpec(arr.shape, lambda i: (0,) * arr.ndim)

    # Advisory cost hint for XLA's scheduler (call is overhead/DMA bound).
    weight_elems = (w1.size + b1.size + w2.size + b2.size + w3.size + b3.size)
    cost = pl.CostEstimate(
        flops=2 * B * (u_dim * hidden + hidden * hidden + hidden * z2),
        transcendentals=2 * B * hidden,
        bytes_accessed=4 * (B * u_dim + B * z2 + weight_elems),
    )

    zT = pl.pallas_call(
        _zprior_kernel,
        out_shape=jax.ShapeDtypeStruct((z2, Bp), u.dtype),
        grid=(grid_n,),
        in_specs=[
            pl.BlockSpec((u_dim, tb), lambda i: (0, i)),   # u^T: tiled on lanes
            full(w1), full(b1),
            full(w2), full(b2),
            full(w3), full(b3),
        ],
        out_specs=pl.BlockSpec((z2, tb), lambda i: (0, i)),
        compiler_params=pltpu.CompilerParams(
            dimension_semantics=("parallel",)),            # megacore on v7x
        cost_estimate=cost,
    )(uT, w1, b1, w2, b2, w3, b3)

    # Back to (B, 2*z_dim); torch.chunk(z, 2, -1) is a cheap wrapper slice.
    z = zT[:, :B].T
    return z[:, :z_dim], z[:, z_dim:]


def init_params(key, u_dim: int, z_dim: int, hidden: int = 32):
    """PyTorch nn.Linear default init: U(-1/sqrt(fan_in), +1/sqrt(fan_in)).

    Weights stored in torch layout (out, in); biases as (out, 1) columns so
    they broadcast over the lane (batch) axis inside the kernel.
    """
    ks = jax.random.split(key, 6)

    def lin(k_w, k_b, fan_in, fan_out):
        bound = 1.0 / jnp.sqrt(float(fan_in))
        w = jax.random.uniform(k_w, (fan_out, fan_in), jnp.float32, -bound, bound)
        b = jax.random.uniform(k_b, (fan_out, 1), jnp.float32, -bound, bound)
        return w, b

    w1, b1 = lin(ks[0], ks[1], u_dim, hidden)
    w2, b2 = lin(ks[2], ks[3], hidden, hidden)
    w3, b3 = lin(ks[4], ks[5], hidden, 2 * z_dim)

    return {"w1": w1, "b1": b1, "w2": w2, "b2": b2, "w3": w3, "b3": b3}


def zprior_continuous_ref(u, params):
    """Pure-JAX reference mirroring the PyTorch module exactly."""
    h = jnp.tanh(u @ params["w1"].T + params["b1"].T)
    h = jnp.tanh(h @ params["w2"].T + params["b2"].T)
    z = h @ params["w3"].T + params["b3"].T
    z_dim = z.shape[-1] // 2
    return z[:, :z_dim], z[:, z_dim:]


if __name__ == "__main__":
    # u is reshaped to (-1, 4) in the original pipeline -> u_dim = 4.
    B, U_DIM, Z_DIM, HIDDEN = 280, 4, 4, 32
    key = jax.random.PRNGKey(0)
    k_u, k_p = jax.random.split(key)
    u = jax.random.normal(k_u, (B, U_DIM), dtype=jnp.float32)
    params = init_params(k_p, U_DIM, Z_DIM, HIDDEN)

    # Default tile_b: B=280 -> forced 2 grid steps (tb=256, Bp=512), so the
    # batch-pipelined / megacore path is exercised even at this small size.
    mean, logvar = zprior_continuous(u, params)
    (mean, logvar) = jax.block_until_ready((mean, logvar))

    mean_ref, logvar_ref = zprior_continuous_ref(u, params)
    assert mean.shape == (B, Z_DIM) and logvar.shape == (B, Z_DIM)
    assert mean.dtype == jnp.float32 and logvar.dtype == jnp.float32
    assert jnp.allclose(mean, mean_ref, atol=1e-5, rtol=1e-5), "mean mismatch"
    assert jnp.allclose(logvar, logvar_ref, atol=1e-5, rtol=1e-5), "logvar mismatch"
    print("KERNEL_OK")
</pallas_src>

<mosaic_0001>
module attributes {stable_mosaic.version = 11 : i64} {
  func.func @_zprior_kernel(%arg0: i32, %arg1: memref<4x256xf32, #tpu.memory_space<vmem>>, %arg2: memref<32x4xf32, #tpu.memory_space<vmem>>, %arg3: memref<32x1xf32, #tpu.memory_space<vmem>>, %arg4: memref<32x32xf32, #tpu.memory_space<vmem>>, %arg5: memref<32x1xf32, #tpu.memory_space<vmem>>, %arg6: memref<8x32xf32, #tpu.memory_space<vmem>>, %arg7: memref<8x1xf32, #tpu.memory_space<vmem>>, %arg8: memref<8x256xf32, #tpu.memory_space<vmem>>) attributes {dimension_semantics = [#tpu.dimension_semantics<parallel>], iteration_bounds = array<i64: 2>, scalar_prefetch = 0 : i64, scratch_operands = 0 : i64, tpu.core_type = #tpu.core_type<tc>, window_params = [{transform_indices = @transform_0, window_bounds = array<i64: 4, 256>}, {pipeline_mode = #tpu.pipeline_mode<synchronous>, transform_indices = @transform_1, window_bounds = array<i64: 32, 4>}, {pipeline_mode = #tpu.pipeline_mode<synchronous>, transform_indices = @transform_2, window_bounds = array<i64: 32, 1>}, {pipeline_mode = #tpu.pipeline_mode<synchronous>, transform_indices = @transform_3, window_bounds = array<i64: 32, 32>}, {pipeline_mode = #tpu.pipeline_mode<synchronous>, transform_indices = @transform_4, window_bounds = array<i64: 32, 1>}, {pipeline_mode = #tpu.pipeline_mode<synchronous>, transform_indices = @transform_5, window_bounds = array<i64: 8, 32>}, {pipeline_mode = #tpu.pipeline_mode<synchronous>, transform_indices = @transform_6, window_bounds = array<i64: 8, 1>}, {transform_indices = @transform_7, window_bounds = array<i64: 8, 256>}]} {
    %c0 = arith.constant 0 : index
    %c0_0 = arith.constant 0 : index
    %0 = vector.load %arg1[%c0, %c0_0] : memref<4x256xf32, #tpu.memory_space<vmem>>, vector<4x256xf32>
    %c0_1 = arith.constant 0 : index
    %c0_2 = arith.constant 0 : index
    %1 = vector.load %arg2[%c0_1, %c0_2] : memref<32x4xf32, #tpu.memory_space<vmem>>, vector<32x4xf32>
    %cst = arith.constant dense<0.000000e+00> : vector<32x256xf32>
    %2 = tpu.matmul %1, %0, %cst {dimension_numbers = #tpu.dot_dimension_numbers<[1], [0], [0], [1], [0, 0, 1, 1], [], []>} : vector<32x4xf32>, vector<4x256xf32>, vector<32x256xf32> -> vector<32x256xf32>
    %c0_3 = arith.constant 0 : index
    %c0_4 = arith.constant 0 : index
    %3 = vector.load %arg3[%c0_3, %c0_4] : memref<32x1xf32, #tpu.memory_space<vmem>>, vector<32x1xf32>
    %4 = vector.broadcast %3 : vector<32x1xf32> to vector<32x256xf32>
    %5 = arith.addf %2, %4 : vector<32x256xf32>
    %6 = math.tanh %5 : vector<32x256xf32>
    %c0_5 = arith.constant 0 : index
    %c0_6 = arith.constant 0 : index
    %7 = vector.load %arg4[%c0_5, %c0_6] : memref<32x32xf32, #tpu.memory_space<vmem>>, vector<32x32xf32>
    %cst_7 = arith.constant dense<0.000000e+00> : vector<32x256xf32>
    %8 = tpu.matmul %7, %6, %cst_7 {dimension_numbers = #tpu.dot_dimension_numbers<[1], [0], [0], [1], [0, 0, 1, 1], [], []>} : vector<32x32xf32>, vector<32x256xf32>, vector<32x256xf32> -> vector<32x256xf32>
    %c0_8 = arith.constant 0 : index
    %c0_9 = arith.constant 0 : index
    %9 = vector.load %arg5[%c0_8, %c0_9] : memref<32x1xf32, #tpu.memory_space<vmem>>, vector<32x1xf32>
    %10 = vector.broadcast %9 : vector<32x1xf32> to vector<32x256xf32>
    %11 = arith.addf %8, %10 : vector<32x256xf32>
    %12 = math.tanh %11 : vector<32x256xf32>
    %c0_10 = arith.constant 0 : index
    %c0_11 = arith.constant 0 : index
    %13 = vector.load %arg6[%c0_10, %c0_11] : memref<8x32xf32, #tpu.memory_space<vmem>>, vector<8x32xf32>
    %cst_12 = arith.constant dense<0.000000e+00> : vector<8x256xf32>
    %14 = tpu.matmul %13, %12, %cst_12 {dimension_numbers = #tpu.dot_dimension_numbers<[1], [0], [0], [1], [0, 0, 1, 1], [], []>} : vector<8x32xf32>, vector<32x256xf32>, vector<8x256xf32> -> vector<8x256xf32>
    %c0_13 = arith.constant 0 : index
    %c0_14 = arith.constant 0 : index
    %15 = vector.load %arg7[%c0_13, %c0_14] : memref<8x1xf32, #tpu.memory_space<vmem>>, vector<8x1xf32>
    %16 = vector.broadcast %15 : vector<8x1xf32> to vector<8x256xf32>
    %17 = arith.addf %14, %16 : vector<8x256xf32>
    %c0_15 = arith.constant 0 : index
    %c0_16 = arith.constant 0 : index
    %18 = vector.load %arg8[%c0_15, %c0_16] : memref<8x256xf32, #tpu.memory_space<vmem>>, vector<8x256xf32>
    tpu.vector_store %arg8[%c0_15, %c0_16], %17 {strides = array<i32>} : memref<8x256xf32, #tpu.memory_space<vmem>>, vector<8x256xf32>,
    return
  }
  func.func @transform_0(%arg0: i32) -> (i32, i32) {
    %c0_i32 = arith.constant 0 : i32
    %c0_i32_0 = arith.constant 0 : i32
    return %c0_i32, %arg0 : i32, i32
  }
  func.func @transform_1(%arg0: i32) -> (i32, i32) {
    %c0_i32 = arith.constant 0 : i32
    %c0_i32_0 = arith.constant 0 : i32
    %c0_i32_1 = arith.constant 0 : i32
    return %c0_i32, %c0_i32_0 : i32, i32
  }
  func.func @transform_2(%arg0: i32) -> (i32, i32) {
    %c0_i32 = arith.constant 0 : i32
    %c0_i32_0 = arith.constant 0 : i32
    %c0_i32_1 = arith.constant 0 : i32
    return %c0_i32, %c0_i32_0 : i32, i32
  }
  func.func @transform_3(%arg0: i32) -> (i32, i32) {
    %c0_i32 = arith.constant 0 : i32
    %c0_i32_0 = arith.constant 0 : i32
    %c0_i32_1 = arith.constant 0 : i32
    return %c0_i32, %c0_i32_0 : i32, i32
  }
  func.func @transform_4(%arg0: i32) -> (i32, i32) {
    %c0_i32 = arith.constant 0 : i32
    %c0_i32_0 = arith.constant 0 : i32
    %c0_i32_1 = arith.constant 0 : i32
    return %c0_i32, %c0_i32_0 : i32, i32
  }
  func.func @transform_5(%arg0: i32) -> (i32, i32) {
    %c0_i32 = arith.constant 0 : i32
    %c0_i32_0 = arith.constant 0 : i32
    %c0_i32_1 = arith.constant 0 : i32
    return %c0_i32, %c0_i32_0 : i32, i32
  }
  func.func @transform_6(%arg0: i32) -> (i32, i32) {
    %c0_i32 = arith.constant 0 : i32
    %c0_i32_0 = arith.constant 0 : i32
    %c0_i32_1 = arith.constant 0 : i32
    return %c0_i32, %c0_i32_0 : i32, i32
  }
  func.func @transform_7(%arg0: i32) -> (i32, i32) {
    %c0_i32 = arith.constant 0 : i32
    %c0_i32_0 = arith.constant 0 : i32
    return %c0_i32, %arg0 : i32, i32
  }
}

</mosaic_0001>

<bundles_post_ra>
// kernel: zprior_continuous.1
= control target key start
LH: loop header
LB: loop body
LE: loop exit
PB: predicated region body
PF: predicated region fallthrough
CT: control target
= control target key end

     0   :  { %s838_s24 = smov 0   ;;  %s931_s0 = inlined_call_operand.vmem [shape: f32[4,512], index: 0, kind: input, shape index: {}]   ;;  %s932_s1 = inlined_call_operand.vmem [shape: f32[32,4], index: 1, kind: input, shape index: {}]   ;;  %s933_s2 = inlined_call_operand.vmem [shape: f32[32,1], index: 2, kind: input, shape index: {}]   ;;  %s934_s3 = inlined_call_operand.vmem [shape: f32[32,32], index: 3, kind: input, shape index: {}]   ;;  %s935_s4 = inlined_call_operand.vmem [shape: f32[32,1], index: 4, kind: input, shape index: {}]   ;;  %s936_s5 = inlined_call_operand.vmem [shape: f32[8,32], index: 5, kind: input, shape index: {}]   ;;  %s937_s6 = inlined_call_operand.vmem [shape: f32[8,1], index: 6, kind: input, shape index: {}]   ;;  %s938_s7 = inlined_call_operand.vmem [shape: f32[8,512], index: 7, kind: output, shape index: {}]  }
   0x1 LB: > { %s705_s25 = sadd.s32 4294967295, %s794_s24   ;;  %p709_p0 = scmp.ge.s32.totalorder %s794_s24, 1  ;;  %s794_s24 = sphi %s838_s24, %s17_s24  }
   0x2   : > { %p238_p1 = scmp.lt.s32.totalorder %s794_s24, 3 }
   0x4   : > { %p239_p2 = pnand %p709_p0, %p238_p1 }
   0x5   : > { %s710_s26 = sshll.u32 (!%p239_p2), %s705_s25, 1  ;;  %v796_v0 = vmov (!%p239_p2), 0.0   ;;  %v287_v1 = vld [vmem:[%s933_s2] sm:$0xff] (!%p239_p2)  ;;  %v797_v2 = vmov (!%p239_p2), 0   ;;  %v289_v3 = vld [vmem:[%s933_s2 + $0x10] sm:$0xff] (!%p239_p2)  ;;  %v288_v4 = vld [vmem:[%s933_s2 + $0x8] sm:$0xff] (!%p239_p2) }
   0x6   : > { %242 = sbr.rel (%p239_p2) target bundleno = 725 (0x2d5), region = 48  ;;  %p271_p3 = scmp.lt.s32.totalorder (!%p239_p2), %s710_s26, 3  ;;  %395 = vmatprep.mubr.f32.mxu0 (!%p239_p2), %v796_v0  ;;  %533 = vmatprep.mubr.f32.mxu1 (!%p239_p2), %v796_v0  ;;  %v290_v5 = vld [vmem:[%s933_s2 + $0x18] sm:$0xff] (!%p239_p2)  ;;  %vm326_vm0 = vcmask (!%p239_p2), 1043456   ;;  %v432_v8 = vld [vmem:[%s935_s4] sm:$0xff] (!%p239_p2)  ;;  %vm313_vm1 = vcmask (!%p239_p2), 31744  }
   0x7   : > { %753 = vset.pattern.permute.xlu0 (!%p239_p2), %v797_v2  ;;  %754 = vset.pattern.permute.xlu1 (!%p239_p2), %v797_v2  ;;  %v283_v9 = vld [vmem:[%s932_s1] sm:$0xff] (!%p239_p2)  ;;  %v433_v10 = vld [vmem:[%s935_s4 + $0x8] sm:$0xff] (!%p239_p2)  ;;  %v434_v11 = vld [vmem:[%s935_s4 + $0x10] sm:$0xff] (!%p239_p2)  ;;  %vm456_vm2 = vcmask (!%p239_p2), 261120  }
   0x8   : > { %293 = vperm.xlu0 (!%p239_p2), %753, %v287_v1   ;;  %303 = vperm.xlu1 (!%p239_p2), %754, %v289_v3   ;;  %v284_v12 = vld [vmem:[%s932_s1 + $0x8] sm:$0xff] (!%p239_p2)  ;;  %v435_v13 = vld [vmem:[%s935_s4 + $0x18] sm:$0xff] (!%p239_p2)  ;;  %v567_v14 = vld [vmem:[%s937_s6] sm:$0xff] (!%p239_p2) }
   0x9   : > { %v285_v15 = vld [vmem:[%s932_s1 + $0x10] sm:$0xff] (!%p239_p2)  ;;  %v286_v16 = vld [vmem:[%s932_s1 + $0x18] sm:$0xff] (!%p239_p2)  ;;  %v428_v49 = vld [vmem:[%s934_s3] sm:$0xff] (!%p239_p2) }
   0xa   : > { %v429_v50 = vld [vmem:[%s934_s3 + $0x8] sm:$0xff] (!%p239_p2)  ;;  %v430_v51 = vld [vmem:[%s934_s3 + $0x10] sm:$0xff] (!%p239_p2)  ;;  %v431_v52 = vld [vmem:[%s934_s3 + $0x18] sm:$0xff] (!%p239_p2) }
   0xc   : > { %298 = vperm.xlu0 (!%p239_p2), %753, %v288_v4   ;;  %308 = vperm.xlu1 (!%p239_p2), %754, %v290_v5  }
   0xd   : > { %s940_s26 = smov (!%p271_p3, %s710_s26), 3 }
   0xe   : > { %s711_s12 = sshll.u32 %s940_s26, 2  ;;  %s713_s23 = sshll.u32 %s940_s26, 3 }
   0xf   : > { %s274_s15 = scalar_lea.vmem %s931_s0, %s711_s12  ;;  %s280_s28 = scalar_lea.vmem %s938_s7, %s713_s23 }
  0x10   : > { %v282_v6 = vld [vmem:[%s274_s15] sm:$0xff]  ;;  %438 = vperm.xlu0 %753, %v432_v8   ;;  %443 = vperm.xlu1 %754, %v433_v10  }
  0x11   : > { %v312_v7 = vcombine.high %v282_v6, %v282_v6 }
  0x13   : > { %714 = vmatprep.subr.msk.mxu0 %vm326_vm0, %v312_v7 }
  0x14   : > { %715 = vmatpush1.msk.msra.mxu0 %vm326_vm0, %v282_v6  ;;  %448 = vperm.xlu0 %753, %v434_v11  }
  0x15   : > { %716 = vmatmul.mubr.msk.f32.vlgmr.msra.gmra.mrb[0].mxu0 %vm313_vm1, %v283_v9  ;;  %453 = vperm.xlu1 %754, %v435_v13  }
  0x16   : > { %401 = vmatprep.mubr.f32.mxu0 %v796_v0 }
  0x18   : > { %570 = vperm.xlu0 %753, %v567_v14  }
  0x19   : > { %717 = vmatmul.mubr.msk.f32.gmra.mrb[2].mxu0 %vm313_vm1, %v284_v12 }
  0x1a   : > { %407 = vmatprep.mubr.f32.mxu0 %v796_v0 }
  0x1d   : > { %718 = vmatmul.mubr.msk.f32.gmra.mrb[4].mxu0 %vm313_vm1, %v285_v15 }
  0x1e   : > { %413 = vmatprep.mubr.f32.mxu0 %v796_v0 }
  0x21   : > { %719 = vmatmul.mubr.msk.f32.gmra.mrb[6].mxu0 %vm313_vm1, %v286_v16 }
  0x22   : > { %640 = vmatprep.mubr.f32.mxu0 %v796_v0 }
  0x87   : > { %v294_v17 = vpop.permute.xlu0 %293  ;;  %v304_v26 = vpop.permute.xlu1 %303 }
  0x8b   : > { %v299_v22 = vpop.permute.xlu0 %298  ;;  %v309_v32 = vpop.permute.xlu1 %308 }
  0x8f   : > { %v439_v53 = vpop.permute.xlu0 %438  ;;  %v444_v58 = vpop.permute.xlu1 %443 }
  0x93   : > { %v449_v63 = vpop.permute.xlu0 %448 }
  0x94   : > { %v454_v4 = vpop.permute.xlu1 %453 }
  0xe8   : > { %v397_v18 = vpop.f32.mrb[0].mxu0 }
  0xe9   : > { %v398_v19 = vadd.f32 %v397_v18, %v294_v17  ;;  %v399_v20 = vpop.f32.mrb[1].mxu0 }
  0xea   : > { %v400_v21 = vadd.f32 %v399_v20, %v294_v17 }
  0xeb   : > { %756 = vtanh.f32 %v398_v19 }
  0xec   : > { %v403_v23 = vpop.f32.mrb[2].mxu0  ;;  %758 = vtanh.f32 %v400_v21  ;;  %v566_v21 = vld [vmem:[%s936_s5] sm:$0xff] }
  0xed   : > { %v404_v24 = vadd.f32 %v403_v23, %v299_v22  ;;  %v405_v25 = vpop.f32.mrb[3].mxu0 }
  0xee   : > { %v406_v27 = vadd.f32 %v405_v25, %v299_v22  ;;  %v571_v22 = vpop.permute.xlu0 %570 }
  0xef   : > { %760 = vtanh.f32 %v404_v24 }
  0xf0   : > { %762 = vtanh.f32 %v406_v27  ;;  %v409_v28 = vpop.f32.mrb[4].mxu0 }
  0xf1   : > { %v410_v29 = vadd.f32 %v409_v28, %v304_v26  ;;  %v411_v30 = vpop.f32.mrb[5].mxu0 }
  0xf2   : > { %v412_v31 = vadd.f32 %v411_v30, %v304_v26 }
  0xf3   : > { %764 = vtanh.f32 %v410_v29 }
  0xf4   : > { %v415_v33 = vpop.f32.mrb[6].mxu0  ;;  %766 = vtanh.f32 %v412_v31 }
  0xf5   : > { %v416_v34 = vadd.f32 %v415_v33, %v309_v32  ;;  %v417_v35 = vpop.f32.mrb[7].mxu0  ;;  %v757_v37 = vpop.eup %756 }
  0xf6   : > { %v418_v36 = vadd.f32 %v417_v35, %v309_v32  ;;  %v759_v38 = vpop.eup %758 }
  0xf7   : > { %768 = vtanh.f32 %v416_v34 }
  0xf8   : > { %770 = vtanh.f32 %v418_v36 }
  0xf9   : > { %v761_v39 = vpop.eup %760 }
  0xfa   : > { %v763_v40 = vpop.eup %762  ;;  %v729_v41 = vpack.c.bf16 %v761_v39, %v757_v37 }
  0xfb   : > { %v727_v42 = vpack.c.bf16 %v763_v40, %v759_v38 }
  0xfd   : > { %728 = vmatprep.subr.bf16.mxu1 %v727_v42  ;;  %v765_v43 = vpop.eup %764 }
  0xfe   : > { %730 = vmatpush1.bf16.msra.mxu1 %v729_v41  ;;  %v767_v44 = vpop.eup %766 }
 0x101   : > { %v769_v45 = vpop.eup %768 }
 0x102   : > { %v771_v46 = vpop.eup %770  ;;  %v733_v47 = vpack.c.bf16 %v769_v45, %v765_v43 }
 0x103   : > { %v731_v48 = vpack.c.bf16 %v771_v46, %v767_v44 }
 0x105   : > { %732 = vmatprep.subr.bf16.mxu1 %v731_v48 }
 0x106   : > { %734 = vmatpush1.bf16.msra.mxu1 %v733_v47 }
 0x109   : > { %720 = vmatmul.mubr.msk.f32.vlgmr.msra.gmra.mrb[0].mxu1 %vm456_vm2, %v428_v49 }
 0x10a   : > { %539 = vmatprep.mubr.f32.mxu1 %v796_v0 }
 0x10d   : > { %721 = vmatmul.mubr.msk.f32.gmra.mrb[2].mxu1 %vm456_vm2, %v429_v50 }
 0x10e   : > { %545 = vmatprep.mubr.f32.mxu1 %v796_v0 }
 0x111   : > { %722 = vmatmul.mubr.msk.f32.gmra.mrb[4].mxu1 %vm456_vm2, %v430_v51 }
 0x112   : > { %551 = vmatprep.mubr.f32.mxu1 %v796_v0 }
 0x115   : > { %723 = vmatmul.mubr.msk.f32.gmra.mrb[6].mxu1 %vm456_vm2, %v431_v52 }
 0x1dc   : > { %v535_v54 = vpop.f32.mrb[0].mxu1 }
 0x1dd   : > { %v536_v55 = vadd.f32 %v535_v54, %v439_v53  ;;  %v537_v56 = vpop.f32.mrb[1].mxu1 }
 0x1de   : > { %v538_v57 = vadd.f32 %v537_v56, %v439_v53 }
 0x1df   : > { %772 = vtanh.f32 %v536_v55 }
 0x1e0   : > { %v541_v59 = vpop.f32.mrb[2].mxu1  ;;  %774 = vtanh.f32 %v538_v57 }
 0x1e1   : > { %v542_v60 = vadd.f32 %v541_v59, %v444_v58  ;;  %v543_v61 = vpop.f32.mrb[3].mxu1 }
 0x1e2   : > { %v544_v62 = vadd.f32 %v543_v61, %v444_v58 }
 0x1e3   : > { %776 = vtanh.f32 %v542_v60 }
 0x1e4   : > { %778 = vtanh.f32 %v544_v62  ;;  %v547_v0 = vpop.f32.mrb[4].mxu1 }
 0x1e5   : > { %v548_v1 = vadd.f32 %v547_v0, %v449_v63  ;;  %v549_v2 = vpop.f32.mrb[5].mxu1 }
 0x1e6   : > { %v550_v3 = vadd.f32 %v549_v2, %v449_v63 }
 0x1e7   : > { %780 = vtanh.f32 %v548_v1 }
 0x1e8   : > { %v553_v5 = vpop.f32.mrb[6].mxu1  ;;  %782 = vtanh.f32 %v550_v3 }
 0x1e9   : > { %v554_v6 = vadd.f32 %v553_v5, %v454_v4  ;;  %v555_v7 = vpop.f32.mrb[7].mxu1  ;;  %v773_v9 = vpop.eup %772 }
 0x1ea   : > { %v556_v8 = vadd.f32 %v555_v7, %v454_v4  ;;  %v775_v10 = vpop.eup %774 }
 0x1eb   : > { %784 = vtanh.f32 %v554_v6 }
 0x1ec   : > { %786 = vtanh.f32 %v556_v8 }
 0x1ed   : > { %v777_v11 = vpop.eup %776 }
 0x1ee   : > { %v779_v12 = vpop.eup %778  ;;  %v737_v13 = vpack.c.bf16 %v777_v11, %v773_v9 }
 0x1ef   : > { %v735_v14 = vpack.c.bf16 %v779_v12, %v775_v10 }
 0x1f1   : > { %736 = vmatprep.subr.bf16.mxu0 %v735_v14  ;;  %v781_v15 = vpop.eup %780 }
 0x1f2   : > { %738 = vmatpush1.bf16.msra.mxu0 %v737_v13  ;;  %v783_v16 = vpop.eup %782 }
 0x1f5   : > { %v785_v17 = vpop.eup %784 }
 0x1f6   : > { %v787_v18 = vpop.eup %786  ;;  %v741_v19 = vpack.c.bf16 %v785_v17, %v781_v15 }
 0x1f7   : > { %v739_v20 = vpack.c.bf16 %v787_v18, %v783_v16 }
 0x1f9   : > { %740 = vmatprep.subr.bf16.mxu0 %v739_v20 }
 0x1fa   : > { %742 = vmatpush1.bf16.msra.mxu0 %v741_v19 }
 0x1fd   : > { %724 = vmatmul.mubr.msk.f32.vlgmr.msra.gmra.mrb[8].mxu0 %vm456_vm2, %v566_v21 }
 0x2d0   : > { %v642_v23 = vpop.f32.mrb[8].mxu0 }
 0x2d1   : > { %v643_v24 = vadd.f32 %v642_v23, %v571_v22  ;;  %v644_v25 = vpop.f32.mrb[9].mxu0 }
 0x2d2   : > { %v645_v26 = vadd.f32 %v644_v25, %v571_v22 }
 0x2d3   : > { %647 = vst [vmem:[%s280_s28] sm:$0xff] %v643_v24 }
 0x2d4   : > { %648 = vst [vmem:[%s280_s28 + $0x8] sm:$0xff] %v645_v26 }
 0x2d5 PF: > { %s17_s24 = sadd.s32 1, %s794_s24  }
 0x2d6   : > { %p14_p4 = scmp.ge.s32.totalorder %s17_s24, 4  }
 0x2d8   :  { %16 = sbr.rel (!%p14_p4) target bundleno = 1 (0x1), region = 78 }

</bundles_post_ra>
